<compile_context>
chip_gen: v5e
topology: v5e:2x2
jax: 0.10.0
libtpu: 0.0.40
codegen_flags: <defaults>
</compile_context>

<pallas_src>
import functools

import jax
import jax.numpy as jnp
import numpy as np
from jax.experimental import pallas as pl
from jax.experimental.pallas import tpu as pltpu


def _bert_embeddings_dna_kernel(ids_ref, tt_ref, word_hbm, type_ref, pos_ref,
                                gamma_ref, beta_ref, out_ref, word_buf,
                                gather_sem, *, hidden, eps, batch_tile, seq):
    """One grid step = `batch_tile` full sequences.

    ids_ref   : [B, S]            int32, SMEM (scalar prefetch)   - word row ids
    tt_ref    : [bt, S, K]        int32, VMEM tile                - token-type ids
    word_hbm  : [V, Hp]           table dtype, HBM (pl.ANY)       - word table
    type_ref  : [Tp, Hp]          table dtype, resident VMEM      - type table
    pos_ref   : [S, Hp]           f32, resident VMEM              - position rows
    gamma_ref : [1, Hp]           f32, resident VMEM (zero-padded cols)
    beta_ref  : [1, Hp]           f32, resident VMEM (zero-padded cols)
    out_ref   : [bt, S, Hp]
    word_buf  : [bt, S, Hp]       VMEM scratch for the gathered word rows
    gather_sem: DMA semaphore shared by all row copies of this step
    """
    f32 = jnp.float32
    n_types = tt_ref.shape[-1]          # K
    tp = type_ref.shape[0]              # padded type vocab
    hp = out_ref.shape[-1]              # padded hidden
    base = pl.program_id(0) * batch_tile

    # ---- 1) issue the word-row gather DMAs (HBM -> VMEM scratch) -------------
    @pl.loop(0, batch_tile)
    def _issue_b(b):
        @pl.loop(0, seq)
        def _issue_s(s):
            row = ids_ref[base + b, s]
            pltpu.make_async_copy(
                word_hbm.at[pl.ds(row, 1)],        # [1, Hp] HBM row
                word_buf.at[b, pl.ds(s, 1)],       # [1, Hp] VMEM row
                gather_sem,
            ).start()

    # ---- 2) token-type one-hot matmul + position add (overlaps the DMAs) -----
    t_iota = jax.lax.broadcasted_iota(jnp.int32, (batch_tile, seq, tp), 2)
    tt = tt_ref[...]                                           # [bt, S, K]
    counts = (tt[:, :, 0:1] == t_iota).astype(jnp.int32)
    for k in range(1, n_types):                                # K small & static
        counts = counts + (tt[:, :, k:k + 1] == t_iota).astype(jnp.int32)
    sel = counts.astype(type_ref.dtype)                        # single cast
    type_emb = jnp.einsum("bst,th->bsh", sel, type_ref[...],
                          preferred_element_type=f32)          # [bt, S, Hp]
    rest = type_emb + pos_ref[...].astype(f32)[None, :, :]     # broadcast, no tile

    # ---- 3) wait for the gathered rows, assemble the embedding sum -----------
    @pl.loop(0, batch_tile * seq)
    def _wait(r):
        # Shared semaphore: every copy has identical size, so waiting once per
        # issued copy (with a same-sized descriptor) is exact.
        pltpu.make_async_copy(word_hbm.at[pl.ds(0, 1)],
                              word_buf.at[0, pl.ds(0, 1)],
                              gather_sem).wait()
    emb = word_buf[...].astype(f32) + rest                     # [bt, S, Hp]

    # ---- 4) LayerNorm over the true hidden dim --------------------------------
    inv_h = 1.0 / hidden
    mean = jnp.sum(emb, axis=-1, keepdims=True) * inv_h
    diff = emb - mean
    if hp == hidden:
        # unpadded hidden: centered two-pass form (no cancellation risk)
        var = jnp.sum(diff * diff, axis=-1, keepdims=True) * inv_h
    else:
        # padded hidden: padded cols of emb are exactly 0, so use the one-pass
        # form (sum over padded cols contributes nothing)
        var = jnp.sum(emb * emb, axis=-1, keepdims=True) * inv_h - mean * mean
    normed = diff * jax.lax.rsqrt(var + eps)
    out_ref[...] = (normed * gamma_ref[...] + beta_ref[...]).astype(out_ref.dtype)


def _round_up(x, m):
    return ((x + m - 1) // m) * m


def _vmem_cap_bytes():
    """Per-core VMEM capacity; conservative fallback = v7x's 64 MiB."""
    try:
        info = pltpu.get_tpu_info()
        for name in ("vmem_capacity_bytes", "vmem_size_bytes", "vmem_bytes"):
            v = getattr(info, name, None)
            if v:
                return int(v)
    except Exception:
        pass
    return 64 * 1024 * 1024


def _pick_batch_tile(B, S, max_rows=2048):
    """Pick batch_tile: keep >=2 grid steps (v7x megacore), prefer 256-row
    (MXU-height) tiles, stay 8-aligned, then go as big as allowed."""
    cands = [bt for bt in range(1, B + 1)
             if B % bt == 0 and ((bt * S) % 8 == 0 or bt == B)]

    def score(bt):
        tm, grid = bt * S, B // bt
        return (tm <= max_rows, grid >= 2, tm % 256 == 0, tm % 8 == 0, tm)

    return max(cands, key=score)


def make_bert_embeddings_dna(word_emb, pos_emb, type_emb, gamma, beta, *,
                             eps=1e-12, table_dtype=None,
                             out_dtype=jnp.float32):
    """One-time setup (pad/cast tables) -> returns the jitted apply fn.

    Pass table_dtype=jnp.bfloat16 to halve gather-DMA bytes and run the type
    matmul on the bf16 MXU path (one-hot counts are exact in bf16).
    """
    V, H = word_emb.shape
    P = pos_emb.shape[0]
    T, Ht = type_emb.shape
    assert Ht == H
    Hp = _round_up(H, 128)                 # lane-dense stores; == H for 768/1024
    Tp = _round_up(T, 8)                   # tiny one-hot contraction dim
    tdt = table_dtype or word_emb.dtype

    def pad_cols(a, cols):
        return jnp.pad(a, ((0, 0), (0, cols - a.shape[1])))

    # Hoisted out of the per-call path: padded/cast once at model setup.
    word_p = pad_cols(word_emb, Hp).astype(tdt)                           # [V, Hp]  (HBM)
    type_p = jnp.pad(type_emb, ((0, Tp - T), (0, Hp - H))).astype(tdt)    # [Tp, Hp]
    pos_p = pad_cols(pos_emb, Hp).astype(jnp.float32)                     # [P, Hp]
    gamma2 = jnp.pad(gamma.reshape(1, H), ((0, 0), (0, Hp - H))).astype(jnp.float32)
    beta2 = jnp.pad(beta.reshape(1, H), ((0, 0), (0, Hp - H))).astype(jnp.float32)
    tbl_isz = jnp.dtype(tdt).itemsize

    @functools.partial(jax.jit, static_argnames=("batch_tile",))
    def apply(input_ids, token_type_ids, batch_tile=None):
        B, S = input_ids.shape
        K = token_type_ids.shape[2]
        assert S <= P, f"seq_len {S} exceeds max_position_embeddings {P}"

        bt = batch_tile if batch_tile is not None else _pick_batch_tile(B, S)
        assert B % bt == 0 and ((bt * S) % 8 == 0 or bt == B)
        grid = (B // bt,)
        TM = bt * S

        ids2d = input_ids.astype(jnp.int32)              # scalar-prefetched (SMEM)
        tt3d = token_type_ids.astype(jnp.int32)
        pos_s = pos_p[:S]                                 # tiny per-call slice

        # ---- generation-aware VMEM budget (per core) -------------------------
        resident = 2 * (Tp * Hp * tbl_isz + S * Hp * 4 + 2 * Hp * 4)
        per_tile = 2 * (TM * K * 4 + TM * Hp * 4)         # tt in + out (dbl-buffered)
        scratch = TM * Hp * tbl_isz                        # gather buffer
        interm = TM * (6 * Hp * 4 + 3 * Tp * 4)            # headroom for temporaries
        cap = int(0.85 * _vmem_cap_bytes())
        vmem_limit = int(min(cap, max(resident + per_tile + scratch + interm
                                      + (4 << 20), 32 << 20)))

        kernel = functools.partial(_bert_embeddings_dna_kernel,
                                   hidden=H, eps=eps, batch_tile=bt, seq=S)

        out = pl.pallas_call(
            kernel,
            out_shape=jax.ShapeDtypeStruct((B, S, Hp), out_dtype),
            grid_spec=pltpu.PrefetchScalarGridSpec(
                num_scalar_prefetch=1,
                grid=grid,
                in_specs=[
                    pl.BlockSpec((bt, S, K), lambda i, ids: (i, 0, 0)),   # token types
                    pl.BlockSpec(memory_space=pl.ANY),                    # word table (HBM)
                    pl.BlockSpec((Tp, Hp), lambda i, ids: (0, 0)),        # type table (resident)
                    pl.BlockSpec((S, Hp), lambda i, ids: (0, 0)),         # positions (resident)
                    pl.BlockSpec((1, Hp), lambda i, ids: (0, 0)),         # gamma
                    pl.BlockSpec((1, Hp), lambda i, ids: (0, 0)),         # beta
                ],
                out_specs=pl.BlockSpec((bt, S, Hp), lambda i, ids: (i, 0, 0)),
                scratch_shapes=[
                    pltpu.VMEM((bt, S, Hp), tdt),        # gathered word rows
                    pltpu.SemaphoreType.DMA(()),         # shared gather semaphore
                ],
            ),
            compiler_params=pltpu.CompilerParams(
                dimension_semantics=("parallel",),
                vmem_limit_bytes=vmem_limit),
        )(ids2d, tt3d, word_p, type_p, pos_s, gamma2, beta2)

        return out if Hp == H else out[..., :H]

    return apply


def _reference(input_ids, token_type_ids, word_emb, pos_emb, type_emb,
               gamma, beta, eps):
    B, S = input_ids.shape
    words = word_emb[input_ids]
    positions = pos_emb[jnp.arange(S)][None, :, :]
    types = type_emb[token_type_ids].sum(axis=2)
    emb = words + positions + types
    mean = emb.mean(-1, keepdims=True)
    var = ((emb - mean) ** 2).mean(-1, keepdims=True)
    return (emb - mean) / jnp.sqrt(var + eps) * gamma + beta


if __name__ == "__main__":
    # Small config consistent with BertEmbeddingsDNA (aa_type_emb=True).
    B, S, H = 2, 8, 32             # batch, seq, hidden_size
    V, P, T, K = 16, 32, 8, 3      # vocab, max_position, type_vocab, aa-type slots
    eps = 1e-12                    # layer_norm_eps

    key = jax.random.PRNGKey(0)
    k_ids, k_tt, k_w, k_p, k_t = jax.random.split(key, 5)

    input_ids = jax.random.randint(k_ids, (B, S), 0, V, dtype=jnp.int32)
    token_type_ids = jax.random.randint(k_tt, (B, S, K), 0, T, dtype=jnp.int32)

    word_emb = 0.02 * jax.random.normal(k_w, (V, H), dtype=jnp.float32)
    word_emb = word_emb.at[0].set(0.0)          # padding_idx=0
    pos_emb = 0.02 * jax.random.normal(k_p, (P, H), dtype=jnp.float32)
    type_emb = 0.02 * jax.random.normal(k_t, (T, H), dtype=jnp.float32)
    type_emb = type_emb.at[0].set(0.0)          # padding_idx=0
    gamma = jnp.ones((H,), jnp.float32)
    beta = jnp.zeros((H,), jnp.float32)

    ref = _reference(input_ids, token_type_ids, word_emb, pos_emb, type_emb,
                     gamma, beta, eps)

    apply_fn = make_bert_embeddings_dna(word_emb, pos_emb, type_emb, gamma,
                                        beta, eps=eps)

    # Auto tile: batch_tile=1 -> grid=(2,) exercises the multi-step gather path.
    out = jax.block_until_ready(apply_fn(input_ids, token_type_ids))
    np.testing.assert_allclose(np.asarray(out), np.asarray(ref),
                               rtol=1e-5, atol=1e-5)

    # Explicit batch_tile=2 -> grid=(1,) exercises the multi-sequence tile path.
    out2 = jax.block_until_ready(apply_fn(input_ids, token_type_ids,
                                          batch_tile=2))
    np.testing.assert_allclose(np.asarray(out2), np.asarray(ref),
                               rtol=1e-5, atol=1e-5)

    print("KERNEL_OK")
</pallas_src>

<mosaic_0001>
module attributes {stable_mosaic.version = 11 : i64} {
  func.func @_bert_embeddings_dna_kernel(%arg0: i32, %arg1: memref<2x8xi32, #tpu.memory_space<smem>>, %arg2: memref<1x8x3xi32, #tpu.memory_space<vmem>>, %arg3: memref<16x128xf32, #tpu.memory_space<any>>, %arg4: memref<8x128xf32, #tpu.memory_space<vmem>>, %arg5: memref<8x128xf32, #tpu.memory_space<vmem>>, %arg6: memref<1x128xf32, #tpu.memory_space<vmem>>, %arg7: memref<1x128xf32, #tpu.memory_space<vmem>>, %arg8: memref<1x8x128xf32, #tpu.memory_space<vmem>>, %arg9: memref<1x8x128xf32, #tpu.memory_space<vmem>>, %arg10: memref<!tpu.dma_semaphore, #tpu.memory_space<semaphore_mem>>) attributes {dimension_semantics = [#tpu.dimension_semantics<parallel>], iteration_bounds = array<i64: 2>, scalar_prefetch = 1 : i64, scratch_operands = 2 : i64, tpu.core_type = #tpu.core_type<tc>, window_params = [{transform_indices = @transform_0, window_bounds = array<i64: 1, 8, 3>}, {}, {pipeline_mode = #tpu.pipeline_mode<synchronous>, transform_indices = @transform_2, window_bounds = array<i64: 8, 128>}, {pipeline_mode = #tpu.pipeline_mode<synchronous>, transform_indices = @transform_3, window_bounds = array<i64: 8, 128>}, {pipeline_mode = #tpu.pipeline_mode<synchronous>, transform_indices = @transform_4, window_bounds = array<i64: 1, 128>}, {pipeline_mode = #tpu.pipeline_mode<synchronous>, transform_indices = @transform_5, window_bounds = array<i64: 1, 128>}, {transform_indices = @transform_6, window_bounds = array<i64: 1, 8, 128>}]} {
    %c1_i32 = arith.constant 1 : i32
    %0 = arith.muli %arg0, %c1_i32 : i32
    %c0_i32 = arith.constant 0 : i32
    %c1_i32_0 = arith.constant 1 : i32
    %1 = arith.muli %c0_i32, %c1_i32_0 : i32
    %c0_i32_1 = arith.constant 0 : i32
    %2 = arith.addi %c0_i32_1, %1 : i32
    %c0_i32_2 = arith.constant 0 : i32
    %c8_i32 = arith.constant 8 : i32
    %3 = arith.addi %c0_i32_2, %c8_i32 : i32
    %c1_i32_3 = arith.constant 1 : i32
    scf.for %arg11 = %c0_i32_2 to %3 step %c1_i32_3  : i32 {
      %c1_i32_30 = arith.constant 1 : i32
      %56 = arith.muli %arg11, %c1_i32_30 : i32
      %c0_i32_31 = arith.constant 0 : i32
      %57 = arith.addi %c0_i32_31, %56 : i32
      %58 = arith.addi %0, %2 : i32
      %59 = arith.index_cast %58 : i32 to index
      %60 = arith.index_cast %57 : i32 to index
      %61 = memref.load %arg1[%59, %60] : memref<2x8xi32, #tpu.memory_space<smem>>
      %c0_i32_32 = arith.constant 0 : i32
      %62 = tpu.memref_slice %arg3[%61, %c0_i32_32] : memref<16x128xf32, #tpu.memory_space<any>> -> memref<1x128xf32, #tpu.memory_space<any>>
      %c0_i32_33 = arith.constant 0 : i32
      %63 = tpu.memref_slice %arg9[%2, %57, %c0_i32_33] : memref<1x8x128xf32, #tpu.memory_space<vmem>> -> memref<1x1x128xf32, #tpu.memory_space<vmem>>
      %64 = tpu.memref_squeeze %63 : memref<1x1x128xf32, #tpu.memory_space<vmem>> -> memref<1x128xf32, #tpu.memory_space<vmem>>
      tpu.enqueue_dma source(%62 : memref<1x128xf32, #tpu.memory_space<any>>) target(%64 : memref<1x128xf32, #tpu.memory_space<vmem>>) target_semaphore(%arg10 : memref<!tpu.dma_semaphore, #tpu.memory_space<semaphore_mem>>)
    }
    %c8_i32_4 = arith.constant 8 : i32
    %c1_i32_5 = arith.constant 1 : i32
    %4 = tpu.iota {dimensions = array<i32: 2>} : vector<1x8x8xi32>
    %c0 = arith.constant 0 : index
    %c0_6 = arith.constant 0 : index
    %c0_7 = arith.constant 0 : index
    %5 = vector.load %arg2[%c0, %c0_6, %c0_7] : memref<1x8x3xi32, #tpu.memory_space<vmem>>, vector<1x8x3xi32>
    %6 = vector.extract_strided_slice %5 {offsets = [0, 0, 0], sizes = [1, 8, 1], strides = [1, 1, 1]} : vector<1x8x3xi32> to vector<1x8x1xi32>
    %7 = vector.broadcast %6 : vector<1x8x1xi32> to vector<1x8x8xi32>
    %8 = arith.cmpi eq, %7, %4 : vector<1x8x8xi32>
    %9 = arith.extui %8 : vector<1x8x8xi1> to vector<1x8x8xi32>
    %10 = vector.extract_strided_slice %5 {offsets = [0, 0, 1], sizes = [1, 8, 1], strides = [1, 1, 1]} : vector<1x8x3xi32> to vector<1x8x1xi32>
    %11 = vector.broadcast %10 : vector<1x8x1xi32> to vector<1x8x8xi32>
    %12 = arith.cmpi eq, %11, %4 : vector<1x8x8xi32>
    %13 = arith.extui %12 : vector<1x8x8xi1> to vector<1x8x8xi32>
    %14 = arith.addi %9, %13 : vector<1x8x8xi32>
    %15 = vector.extract_strided_slice %5 {offsets = [0, 0, 2], sizes = [1, 8, 1], strides = [1, 1, 1]} : vector<1x8x3xi32> to vector<1x8x1xi32>
    %16 = vector.broadcast %15 : vector<1x8x1xi32> to vector<1x8x8xi32>
    %17 = arith.cmpi eq, %16, %4 : vector<1x8x8xi32>
    %18 = arith.extui %17 : vector<1x8x8xi1> to vector<1x8x8xi32>
    %19 = arith.addi %14, %18 : vector<1x8x8xi32>
    %20 = arith.sitofp %19 : vector<1x8x8xi32> to vector<1x8x8xf32>
    %c0_8 = arith.constant 0 : index
    %c0_9 = arith.constant 0 : index
    %21 = vector.load %arg4[%c0_8, %c0_9] : memref<8x128xf32, #tpu.memory_space<vmem>>, vector<8x128xf32>
    "tpu.trace_start"() <{level = 10 : i32, message = "bst,th->bsh"}> : () -> ()
    %cst = arith.constant dense<0.000000e+00> : vector<1x8x128xf32>
    %22 = tpu.matmul %20, %21, %cst {dimension_numbers = #tpu.dot_dimension_numbers<[2], [0], [0, 1], [1], [0, 0, 0, 1, 1, 1], [], []>} : vector<1x8x8xf32>, vector<8x128xf32>, vector<1x8x128xf32> -> vector<1x8x128xf32>
    "tpu.trace_stop"() : () -> ()
    %c0_10 = arith.constant 0 : index
    %c0_11 = arith.constant 0 : index
    %23 = vector.load %arg5[%c0_10, %c0_11] : memref<8x128xf32, #tpu.memory_space<vmem>>, vector<8x128xf32>
    %24 = vector.shape_cast %23 : vector<8x128xf32> to vector<1x8x128xf32>
    %25 = arith.addf %22, %24 : vector<1x8x128xf32>
    %c0_i32_12 = arith.constant 0 : i32
    %c8_i32_13 = arith.constant 8 : i32
    %26 = arith.addi %c0_i32_12, %c8_i32_13 : i32
    %c1_i32_14 = arith.constant 1 : i32
    scf.for %arg11 = %c0_i32_12 to %26 step %c1_i32_14  : i32 {
      %c0_i32_30 = arith.constant 0 : i32
      %c0_i32_31 = arith.constant 0 : i32
      %c0_i32_32 = arith.constant 0 : i32
      %56 = tpu.memref_slice %arg3[%c0_i32_31, %c0_i32_32] : memref<16x128xf32, #tpu.memory_space<any>> -> memref<1x128xf32, #tpu.memory_space<any>>
      %c0_i32_33 = arith.constant 0 : i32
      %c0_i32_34 = arith.constant 0 : i32
      %57 = tpu.memref_slice %arg9[%c0_i32_30, %c0_i32_33, %c0_i32_34] : memref<1x8x128xf32, #tpu.memory_space<vmem>> -> memref<1x1x128xf32, #tpu.memory_space<vmem>>
      %58 = tpu.memref_squeeze %57 : memref<1x1x128xf32, #tpu.memory_space<vmem>> -> memref<1x128xf32, #tpu.memory_space<vmem>>
      tpu.wait_dma2 semaphore(%arg10 : memref<!tpu.dma_semaphore, #tpu.memory_space<semaphore_mem>>) src(%56 : memref<1x128xf32, #tpu.memory_space<any>>) dst(%58 : memref<1x128xf32, #tpu.memory_space<vmem>>)
    }
    %c0_15 = arith.constant 0 : index
    %c0_16 = arith.constant 0 : index
    %c0_17 = arith.constant 0 : index
    %27 = vector.load %arg9[%c0_15, %c0_16, %c0_17] : memref<1x8x128xf32, #tpu.memory_space<vmem>>, vector<1x8x128xf32>
    %28 = arith.addf %27, %25 : vector<1x8x128xf32>
    %cst_18 = arith.constant dense<0.000000e+00> : vector<1x8xf32>
    %29 = vector.multi_reduction <add>, %28, %cst_18 [2] : vector<1x8x128xf32> to vector<1x8xf32>
    %30 = vector.shape_cast %29 : vector<1x8xf32> to vector<1x8x1xf32>
    %cst_19 = arith.constant 3.125000e-02 : f32
    %31 = vector.broadcast %cst_19 : f32 to vector<1x8x1xf32>
    %32 = arith.mulf %30, %31 : vector<1x8x1xf32>
    %33 = vector.broadcast %32 : vector<1x8x1xf32> to vector<1x8x128xf32>
    %34 = arith.subf %28, %33 : vector<1x8x128xf32>
    %35 = arith.mulf %28, %28 : vector<1x8x128xf32>
    %cst_20 = arith.constant dense<0.000000e+00> : vector<1x8xf32>
    %36 = vector.multi_reduction <add>, %35, %cst_20 [2] : vector<1x8x128xf32> to vector<1x8xf32>
    %37 = vector.shape_cast %36 : vector<1x8xf32> to vector<1x8x1xf32>
    %cst_21 = arith.constant 3.125000e-02 : f32
    %38 = vector.broadcast %cst_21 : f32 to vector<1x8x1xf32>
    %39 = arith.mulf %37, %38 : vector<1x8x1xf32>
    %40 = arith.mulf %32, %32 : vector<1x8x1xf32>
    %41 = arith.subf %39, %40 : vector<1x8x1xf32>
    %cst_22 = arith.constant 9.99999996E-13 : f32
    %42 = vector.broadcast %cst_22 : f32 to vector<1x8x1xf32>
    %43 = arith.addf %41, %42 : vector<1x8x1xf32>
    %44 = math.rsqrt %43 : vector<1x8x1xf32>
    %45 = vector.broadcast %44 : vector<1x8x1xf32> to vector<1x8x128xf32>
    %46 = arith.mulf %34, %45 : vector<1x8x128xf32>
    %c0_23 = arith.constant 0 : index
    %c0_24 = arith.constant 0 : index
    %47 = vector.load %arg6[%c0_23, %c0_24] : memref<1x128xf32, #tpu.memory_space<vmem>>, vector<1x128xf32>
    %48 = vector.shape_cast %47 : vector<1x128xf32> to vector<1x1x128xf32>
    %49 = vector.broadcast %48 : vector<1x1x128xf32> to vector<1x8x128xf32>
    %50 = arith.mulf %46, %49 : vector<1x8x128xf32>
    %c0_25 = arith.constant 0 : index
    %c0_26 = arith.constant 0 : index
    %51 = vector.load %arg7[%c0_25, %c0_26] : memref<1x128xf32, #tpu.memory_space<vmem>>, vector<1x128xf32>
    %52 = vector.shape_cast %51 : vector<1x128xf32> to vector<1x1x128xf32>
    %53 = vector.broadcast %52 : vector<1x1x128xf32> to vector<1x8x128xf32>
    %54 = arith.addf %50, %53 : vector<1x8x128xf32>
    %c0_27 = arith.constant 0 : index
    %c0_28 = arith.constant 0 : index
    %c0_29 = arith.constant 0 : index
    %55 = vector.load %arg8[%c0_27, %c0_28, %c0_29] : memref<1x8x128xf32, #tpu.memory_space<vmem>>, vector<1x8x128xf32>
    tpu.vector_store %arg8[%c0_27, %c0_28, %c0_29], %54 {strides = array<i32>} : memref<1x8x128xf32, #tpu.memory_space<vmem>>, vector<1x8x128xf32>,
    return
  }
  func.func @transform_0(%arg0: i32, %arg1: memref<2x8xi32, #tpu.memory_space<smem>>) -> (i32, i32, i32) {
    %c0_i32 = arith.constant 0 : i32
    %c0_i32_0 = arith.constant 0 : i32
    %c0_i32_1 = arith.constant 0 : i32
    return %arg0, %c0_i32, %c0_i32_0 : i32, i32, i32
  }
  func.func @transform_2(%arg0: i32, %arg1: memref<2x8xi32, #tpu.memory_space<smem>>) -> (i32, i32) {
    %c0_i32 = arith.constant 0 : i32
    %c0_i32_0 = arith.constant 0 : i32
    %c0_i32_1 = arith.constant 0 : i32
    return %c0_i32, %c0_i32_0 : i32, i32
  }
  func.func @transform_3(%arg0: i32, %arg1: memref<2x8xi32, #tpu.memory_space<smem>>) -> (i32, i32) {
    %c0_i32 = arith.constant 0 : i32
    %c0_i32_0 = arith.constant 0 : i32
    %c0_i32_1 = arith.constant 0 : i32
    return %c0_i32, %c0_i32_0 : i32, i32
  }
  func.func @transform_4(%arg0: i32, %arg1: memref<2x8xi32, #tpu.memory_space<smem>>) -> (i32, i32) {
    %c0_i32 = arith.constant 0 : i32
    %c0_i32_0 = arith.constant 0 : i32
    %c0_i32_1 = arith.constant 0 : i32
    return %c0_i32, %c0_i32_0 : i32, i32
  }
  func.func @transform_5(%arg0: i32, %arg1: memref<2x8xi32, #tpu.memory_space<smem>>) -> (i32, i32) {
    %c0_i32 = arith.constant 0 : i32
    %c0_i32_0 = arith.constant 0 : i32
    %c0_i32_1 = arith.constant 0 : i32
    return %c0_i32, %c0_i32_0 : i32, i32
  }
  func.func @transform_6(%arg0: i32, %arg1: memref<2x8xi32, #tpu.memory_space<smem>>) -> (i32, i32, i32) {
    %c0_i32 = arith.constant 0 : i32
    %c0_i32_0 = arith.constant 0 : i32
    %c0_i32_1 = arith.constant 0 : i32
    return %arg0, %c0_i32, %c0_i32_0 : i32, i32, i32
  }
}

</mosaic_0001>

<bundles_post_ra>
// kernel: apply.1
= control target key start
LH: loop header
LB: loop body
LE: loop exit
PB: predicated region body
PF: predicated region fallthrough
CT: control target
= control target key end

     0   :  { %s718_s27 = smov [#allocation5]   ;;  %s879_s0 = inlined_call_operand.vmem [shape: s32[2,8], index: 0, kind: input, shape index: {}]   ;;  %s880_s1 = inlined_call_operand.vmem [shape: s32[2,8,3], index: 1, kind: input, shape index: {}]   ;;  %s881_s2 = inlined_call_operand.vmem [shape: f32[16,128], index: 2, kind: input, shape index: {}]   ;;  %s882_s3 = inlined_call_operand.hbm [shape: f32[8,128], index: 3, kind: input, shape index: {}]   ;;  %s883_s4 = inlined_call_operand.vmem [shape: f32[8,128], index: 4, kind: input, shape index: {}]   ;;  %s884_s5 = inlined_call_operand.vmem [shape: f32[1,128], index: 5, kind: input, shape index: {}]   ;;  %s885_s6 = inlined_call_operand.vmem [shape: f32[1,128], index: 6, kind: input, shape index: {}]   ;;  %s886_s7 = inlined_call_operand.hbm [shape: f32[2,8,128], index: 7, kind: output, shape index: {}]  }
   0x1   :  { %888 = sst [smem:[#allocation16_spill]] %s882_s3  ;;  %s13_s26 = sshll.u32 %s879_s0, 4  ;;  %s14_s26 = int_to_ptr.vmem [resolvable:$true] %s13_s26 }
   0x2   :  { %16 = dma.vmem_to_smem %s14_s26, 32, %s718_s27, [#allocation4] }
   0x3   :  { %682 = dma.done.wait [#allocation4], 32 }
   0x4   :  { %683 = vsyncadd [#allocation4], 4294967264 }
   0x5   :  { %19 = sfence }
   0x6   :  { %20 = vsyncpa [#allocation7], 0 }
   0x7   :  { %21 = vsyncpa [#allocation8], 0 }
   0x8   :  { %23 = vsyncpa [#allocation8 + $0x1], 0  ;;  %s766_s28 = smov 0   ;;  %s768_s29 = smov 0  }
   0x9   :  { %s770_s30 = smov 0   ;;  %s772_s8 = smov 0  }
   0xa LB: > { %s787_s0 = sadd.s32 4294967295, %s708_s8   ;;  %s495_s9 = sadd.s32 4294967294, %s708_s8   ;;  %s708_s8 = sphi %s772_s8, %s898_s8   ;;  %s704_s30 = sphi %s770_s30, %s897_s30   ;;  %s700_s29 = sphi %s768_s29, %s896_s29   ;;  %s696_s28 = sphi %s766_s28, %s895_s28  }
   0xb   : > { %s791_s10 = sadd.s32 1, %s708_s8   ;;  %s146_s11 = sadd.s32 1, %s704_s30 }
   0xc   : > { %s143_s12 = ssub.s32 %s708_s8, %s791_s10  ;;  %p156_p0 = scmp.ne.s32.totalorder %s704_s30, %s700_s29 }
   0xd   : > { %p144_p1 = scmp.eq.s32.totalorder %s143_s12, 0  ;;  %p157_p2 = scmp.eq.s32.totalorder %s787_s0, 1 }
   0xe   : > { %p162_p3 = scmp.ne.s32.totalorder %s700_s29, %s696_s28  ;;  %p163_p4 = scmp.eq.s32.totalorder %s495_s9, 1 }
   0xf   : > { %s802_s13 = scalar_select %p144_p1, %s704_s30, %s146_s11  }
  0x10   : > { %p804_p5 = por %p157_p2, %p156_p0  ;;  %p808_p6 = por %p163_p4, %p162_p3 }
  0x11   : > { %889 = sst [smem:[#allocation15_spill]] %s802_s13  ;;  %p496_p7 = scmp.ge.s32.totalorder %s708_s8, 1 }
  0x12   : > { %p170_p8 = scmp.lt.s32.totalorder %s708_s8, 3  ;;  %p524_p9 = scmp.eq.s32.totalorder %s787_s0, 0 }
  0x13   : > { %s892_s3 = sld [smem:[#allocation16_spill]]  ;;  %s719_s19 = smov [#allocation6]  }
  0x14   : > { %p171_p10 = pnand %p496_p7, %p170_p8  ;;  %s184_s20 = sshll.u32 %s719_s19, 4  ;;  %s185_s20 = int_to_ptr.vmem [resolvable:$true] %s184_s20 }
  0x16   : > { %p516_p11 = pneg %p171_p10  ;;  %213 = sbr.rel (%p171_p10) target bundleno = 473 (0x1d9), region = 40 }
  0x18   : > { %p517_p12 = pnand %p524_p9, %p516_p11 }
  0x19   : > { %s182_s18 = sshll.u32 %s892_s3, 4  ;;  %s183_s18 = int_to_ptr.hbm [resolvable:$true] %s182_s18 }
  0x1a   : > { %519 = dma.hbm_to_vmem [thread:$0]  (!%p517_p12), %s183_s18, 128, %s185_s20, [#allocation7]  }
  0x1b   : > { %685 = dma.done.wait (%p524_p9), [#allocation7], 128  }
  0x1c   : > { %687 = vsyncadd (%p524_p9), [#allocation7], 4294967168  ;;  %s887_s21 = sand.u32 1, %s700_s29   ;;  %p241_p13 = scmp.lt.s32.totalorder %s787_s0, 1 }
  0x1d   : > { %s822_s22 = sshll.u32 %s887_s21, 3  ;;  %s710_s11 = smov 0  }
  0x1e   : > { %s242_s23 = scalar_select %p241_p13, %s787_s0, 1 }
  0x1f   : > { %s240_s9 = scalar_lea.vmem [#allocation9], %s822_s22 }
  0x20   : > { %s502_s24 = sshll.u32 %s242_s23, 3 }
  0x21   : > { %s244_s27 = scalar_lea.vmem %s880_s1, %s502_s24 }
  0x22 LB: >> { %s251_s12 = sshra.s32 %s712_s11, 7  ;;  %s256_s16 = sand.u32 127, %s712_s11  ;;  %s712_s11 = sphi %s710_s11, %s250_s11  }
  0x23   : >> { %s253_s17 = sadd.s32 %s787_s0, %s251_s12  ;;  %s260_s13 = scalar_lea.vmem [#allocation2], %s712_s11 }
  0x24   : >> { %s503_s18 = sshll.u32 %s253_s17, 7 }
  0x25   : >> { %s257_s19 = sadd.s32 %s503_s18, %s256_s16 }
  0x26   : >> { %s258_s20 = sld [smem:[#allocation5 + %s257_s19]] }
  0x2c   : >> { %s259_s23 = scalar_lea.vmem %s881_s2, %s258_s20 }
  0x2d   : >> { %v275_v0 = vld [vmem:[%s259_s23] sm:$0x1] }
  0x2e   : >> { %276 = vst [vmem:[%s260_s13] sm:$0x1] %v275_v0 }
  0x2f   : >> { %294 = vsyncadd [#allocation3], 16  ;;  %s250_s11 = sadd.s32 1, %s712_s11  }
  0x30   : >> { %p247_p0 = scmp.ge.s32.totalorder %s250_s11, 8  }
  0x31   : > { %v297_v1 = vld [vmem:[%s244_s27] sm:$0xff] (%p247_p0)  ;;  %v720_v2 = vmov (%p247_p0), 0   ;;  %v721_v3 = vmov (%p247_p0), 2   ;;  %v722_v4 = vmov (%p247_p0), 1   ;;  %v316_v5 = vld [vmem:[#allocation6] sm:$0xff] (%p247_p0)  ;;  %v295_v7 = vlaneseq (%p247_p0)  ;;  %s714_s21 = smov (%p247_p0), 0  }
  0x32   : > { %249 = sbr.rel (!%p247_p0) target bundleno = 34 (0x22), region = 130  ;;  %580 = vset.pattern.permute.xlu0 (%p247_p0), %v720_v2  ;;  %582 = vset.pattern.permute.xlu1 (%p247_p0), %v721_v3  ;;  %vm318_vm3 = vcmask (%p247_p0), 64512   ;;  %v317_v17 = vld [vmem:[%s883_s4] sm:$0xff] (%p247_p0) }
  0x33   : > { %299 = vperm.xlu0 (%p247_p0), %580, %v297_v1   ;;  %310 = vperm.xlu1 (%p247_p0), %582, %v297_v1   ;;  %v296_v8 = vand.u32 (%p247_p0), 127, %v295_v7 }
  0x34   : > { %337 = vmatpush.msra.mxu0 (%p247_p0), %v316_v5 }
  0x3b   : > { %581 = vset.pattern.permute.xlu0 %v722_v4 }
  0x3c   : > { %304 = vperm.xlu0 %581, %v297_v1  }
  0x44   : > { %583 = vset.pattern.permute.xlu0 %v721_v3 }
  0xa5   : > { %v300_v6 = vpop.permute.xlu0 %299  ;;  %v311_v9 = vpop.permute.xlu1 %310 }
  0xa6   : > { %vm301_vm0 = vcmp.eq.s32.totalorder %v300_v6, %v296_v8  ;;  %vm312_vm1 = vcmp.eq.s32.totalorder %v311_v9, %v296_v8 }
  0xa7   : > { %v302_v11 = vsel %vm301_vm0, 1, %v720_v2  ;;  %v313_v13 = vsel %vm312_vm1, 1, %v720_v2 }
  0xae   : > { %v305_v10 = vpop.permute.xlu0 %304 }
  0xaf   : > { %vm306_vm2 = vcmp.eq.s32.totalorder %v305_v10, %v296_v8 }
  0xb0   : > { %v307_v12 = vsel %vm306_vm2, 1, %v720_v2 }
  0xb1   : > { %v308_v14 = vadd.s32 %v307_v12, %v302_v11 }
  0xb3   : > { %v314_v15 = vadd.s32 %v313_v13, %v308_v14 }
  0xb5   : > { %v315_v16 = vcvt.s32.f32 %v314_v15 }
  0xb7   : > { %504 = vmatmul.msk.f32.vlgmr.msra.gmra.mxu0 %vm318_vm3, %v315_v16 }
 0x134   : > { %v339_v18 = vpop.f32.mrf.mxu0 }
 0x135   : > { %v340_v19 = vadd.f32 %v339_v18, %v317_v17 }
 0x136 LB: >> { %688 = dma.done.wait [#allocation3], 16  ;;  %s716_s21 = sphi %s714_s21, %s347_s21  }
 0x137   : >> { %689 = vsyncadd [#allocation3], 4294967280  ;;  %s347_s21 = sadd.s32 1, %s716_s21  }
 0x138   : >> { %p344_p1 = scmp.ge.s32.totalorder %s347_s21, 8  }
 0x139   : > { %v351_v20 = vld [vmem:[#allocation2] sm:$0xff] (%p344_p1)  ;;  %s506_s24 = sshll.u32 (%p344_p1), %s787_s0, 3  ;;  %s399_s0 = sshll.u32 (%p344_p1), %s240_s9, 4  ;;  %s400_s0 = int_to_ptr.vmem [resolvable:$true] %s399_s0 }
 0x13a   : > { %346 = sbr.rel (!%p344_p1) target bundleno = 310 (0x136), region = 141  ;;  %v352_v21 = vadd.f32 (%p344_p1), %v351_v20, %v340_v19  ;;  %v584_v37 = vld [vmem:[%s884_s5] ss:$0 sm:$0xff] (%p344_p1)  ;;  %s397_s12 = scalar_lea.hbm (%p344_p1), %s886_s7, %s506_s24 }
 0x13b   : > { %v585_v40 = vld [vmem:[%s885_s6] ss:$0 sm:$0xff] (%p344_p1)  ;;  %s401_s18 = sshll.u32 (%p344_p1), %s397_s12, 4  ;;  %s893_s19 = sand.u32 (%p344_p1), 1, %s700_s29   ;;  %s402_s18 = int_to_ptr.hbm [resolvable:$true] %s401_s18 }
 0x13c   : > { %353 = vadd.xlane.f32.xlu0 (%p344_p1), %v352_v21  ;;  %v357_v22 = vmul.f32 (%p344_p1), %v352_v21, %v352_v21  ;;  %s387_s20 = scalar_lea.sflag (%p344_p1), [#allocation8], %s893_s19  ;;  %s644_s23 = sshra.s32 (%p344_p1), %s402_s18, 4  ;;  %s645_s23 = int_to_ptr.hbm [resolvable:$true] %s644_s23 }
 0x13d   : > { %s646_s3 = scalar_lea.hbm (%p344_p1), %s645_s23, 8  ;;  %s650_s24 = scalar_lea.hbm (%p344_p1), %s886_s7, 16 }
 0x13e   : > { %p647_p2 = scmp.ne.s32.totalorder (%p344_p1), %s645_s23, %s646_s3  ;;  %p651_p7 = scmp.lt.s32.totalorder (%p344_p1), %s645_s23, %s886_s7 }
 0x13f   : > { %p652_p8 = scmp.lt.s32.totalorder %s650_s24, %s646_s3 }
 0x140   : > { %p648_p3 = pnand %p647_p2, %p804_p5 }
 0x141   : > { %p653_p9 = por %p652_p8, %p651_p7 }
 0x142   : > { %p649_p4 = pneg %p648_p3 }
 0x144   : > { %358 = vadd.xlane.f32.xlu0 %v357_v22  ;;  %p654_p10 = pnand %p653_p9, %p649_p4 }
 0x1af   : > { %v354_v23 = vpop.xlane.xlu0 %353 }
 0x1b0   : > { %v355_v24 = vmul.f32 0.03125, %v354_v23 }
 0x1b2   : > { %v361_v26 = vmul.f32 %v355_v24, %v355_v24  ;;  %v356_v36 = vsub.f32 %v352_v21, %v355_v24 }
 0x1b7   : > { %v359_v25 = vpop.xlane.xlu0 %358 }
 0x1b8   : > { %v360_v27 = vmul.f32 0.03125, %v359_v25 }
 0x1ba   : > { %v362_v28 = vsub.f32 %v360_v27, %v361_v26 }
 0x1bc   : > { %v363_v29 = vadd.f32 1e-12, %v362_v28 }
 0x1be   : > { %586 = vrsqrt.f32 %v363_v29  ;;  %vm370_vm5 = vweird.f32 %v363_v29 }
 0x1c4   : > { %v587_v30 = vpop.eup %586 }
 0x1c5   : > { %v365_v31 = vmul.f32 %v587_v30, %v363_v29  ;;  %vm371_vm4 = vweird.f32 %v587_v30 }
 0x1c6   : > { %vm372_vm6 = vmor %vm370_vm5, %vm371_vm4 }
 0x1c7   : > { %v366_v32 = vmul.f32 %v587_v30, %v365_v31 }
 0x1c9   : > { %v367_v33 = vmul.f32 0.5, %v366_v32 }
 0x1cb   : > { %v368_v34 = vsub.f32 1.5, %v367_v33 }
 0x1cd   : > { %v369_v35 = vmul.f32 %v587_v30, %v368_v34 }
 0x1cf   : > { %v373_v38 = vsel %vm372_vm6, %v587_v30, %v369_v35 }
 0x1d0   : > { %v374_v39 = vmul.f32 %v373_v38, %v356_v36 }
 0x1d2   : > { %v379_v41 = vmul.f32 %v584_v37, %v374_v39 }
 0x1d4   : > { %v384_v42 = vadd.f32 %v585_v40, %v379_v41 }
 0x1d6   : > { %385 = vst [vmem:[%s240_s9] sm:$0xff] %v384_v42 }
 0x1d7   : > { %657 = shalt.err (!%p654_p10)
}
 0x1d8   : > { %514 = dma.vmem_to_hbm [thread:$0]  (%p804_p5), %s400_s0, 128, %s402_s18, %s387_s20  }
 0x1d9 PF: > { %p526_p11 = scmp.ge.s32.totalorder %s708_s8, 2  ;;  %s413_s22 = sand.u32 1, %s696_s28  }
 0x1da   : > { %s414_s9 = scalar_lea.sflag [#allocation8], %s413_s22 }
 0x1db   : > { %p521_p12 = pnand %p526_p11, %p808_p6 }
 0x1dd   : > { %p522_p13 = pneg %p521_p12 }
 0x1df   : > { %691 = dma.done.wait (%p522_p13), %s414_s9, 128  }
 0x1e0   : > { %693 = vsyncadd (%p522_p13), %s414_s9, 4294967168  ;;  %s894_s27 = sld [smem:[#allocation15_spill]]  ;;  %p26_p0 = scmp.ge.s32.totalorder %s791_s10, 4  }
 0x1e1   : > { %s895_s28 = smov %s700_s29  ;;  %s896_s29 = smov %s704_s30 }
 0x1e2   : > { %s898_s8 = smov %s791_s10  ;;  %28 = sbr.rel (!%p26_p0) target bundleno = 10 (0xa), region = 152 }
 0x1e6   : > { %s897_s30 = smov %s894_s27 }
 0x1e7   :  { %420 = vsyncpa [#allocation7], 1 }
 0x1e8   :  { %422 = vsyncpa [#allocation7 + $0x1], 1 }
 0x1e9   :  { %423 = vsyncpa [#allocation8], 1 }
 0x1ea   :  { %425 = vsyncpa [#allocation8 + $0x1], 1 }
 0x1eb   :  { %426 = vsyncmov [#allocation3] }
 0x1ee   :  { %s427_s8 = vpop.sfrf %426 }
 0x1ef   :  { %p509_p5 = scmp.ne.s32.totalorder %s427_s8, 0 }
 0x1f1   :  { %431 = shalt.err (%p509_p5)  }

</bundles_post_ra>
